<compile_context>
chip_gen: v6e
topology: v6e:2x2x1
jax: 0.10.0
libtpu: 0.0.40
codegen_flags: <defaults>
</compile_context>

<pallas_src>
import jax
import jax.numpy as jnp
from jax.experimental import pallas as pl
from jax.experimental.pallas import tpu as pltpu

_LANE = 128
# Widest candidates first: longer contiguous DMAs, fewer strided transfers.
_WIDTH_CANDIDATES = (8192, 4096, 2048, 1024, 512, 256, 128)


def _neg_kernel(x_ref, o_ref):
    # Elementwise negation on the current VMEM tile (pure VPU op).
    o_ref[...] = -x_ref[...]


def _hw_budget():
    """Return (target block bytes, scoped-VMEM limit) per TPU generation."""
    try:
        vmem_cap = int(pltpu.get_tpu_info().vmem_capacity_bytes)
    except Exception:  # info unavailable at trace time -> be conservative
        vmem_cap = 64 * 1024 * 1024
    if vmem_cap <= 64 * 1024 * 1024:
        # v7x-class: 64 MiB physical VMEM per TC. 8 MiB blocks give a
        # double-buffered in+out footprint of 32 MiB; keep the scoped limit
        # at 40 MiB (well under physical, with headroom).
        return 8 * 1024 * 1024, 40 * 1024 * 1024
    # v5e / v6e: 128 MiB physical VMEM. 8 MiB blocks need the scoped limit
    # raised above the 16/32 MiB defaults.
    return 8 * 1024 * 1024, 64 * 1024 * 1024


def _neg_2d(x2d: jax.Array) -> jax.Array:
    """Negate a (rows, W) lane-dense slab with a tiled, pipelined Pallas call."""
    rows, w = x2d.shape
    itemsize = int(jnp.dtype(x2d.dtype).itemsize)
    target_block_bytes, vmem_limit = _hw_budget()

    # Sublane alignment scaled for packed sub-32-bit dtypes:
    # f32 -> 8, bf16 -> 16, int8/fp8 -> 32.
    row_align = 8 * max(1, 4 // itemsize)

    # Rows per block targeting ~target_block_bytes per input block.
    tile_r = max(row_align,
                 (target_block_bytes // (w * itemsize)) // row_align * row_align)

    if tile_r >= rows:
        if rows >= 2 * row_align:
            # Split into >= 2 balanced blocks so both v7x TensorCores stream.
            tile_r = ((pl.cdiv(rows, 2) + row_align - 1) // row_align) * row_align
        else:
            # Tiny tensor: one full-extent block (exempt from the (8,) rule).
            tile_r = rows

    grid = (pl.cdiv(rows, tile_r),)
    nbytes = rows * w * itemsize

    return pl.pallas_call(
        _neg_kernel,
        out_shape=jax.ShapeDtypeStruct((rows, w), x2d.dtype),
        grid=grid,
        in_specs=[pl.BlockSpec((tile_r, w), lambda i: (i, 0))],
        out_specs=pl.BlockSpec((tile_r, w), lambda i: (i, 0)),
        compiler_params=pltpu.CompilerParams(
            # Independent blocks: lets v7x shard the loop across its 2 TCs.
            dimension_semantics=("parallel",),
            vmem_limit_bytes=vmem_limit,
        ),
        cost_estimate=pl.CostEstimate(
            flops=rows * w,
            transcendentals=0,
            bytes_accessed=2 * nbytes,  # one read + one write of the array
        ),
    )(x2d)


def _neg_flat_aligned(x_flat: jax.Array) -> jax.Array:
    """Negate a flat array whose length is a multiple of 128."""
    n = x_flat.size
    width = next(c for c in _WIDTH_CANDIDATES if n % c == 0)
    return _neg_2d(x_flat.reshape(n // width, width)).reshape(-1)


def my_loss_neg(out: jax.Array) -> jax.Array:
    """Computes loss = -out with a Pallas TPU kernel (MyLossNeg.forward)."""
    orig_shape = out.shape
    n = out.size
    if n == 0:
        return out  # negation of an empty tensor is itself
    x_flat = out.reshape(-1)

    if n % _LANE == 0:
        # Common case: reshape-only wrapper (free for contiguous arrays).
        return _neg_flat_aligned(x_flat).reshape(orig_shape)

    # n not a multiple of 128: run the kernel on the 128-aligned bulk and
    # negate the (<128-element) tail with plain jnp -- no full-tensor
    # pad/slice round trip.
    n_bulk = (n // _LANE) * _LANE
    if n_bulk == 0:
        # Fewer than 128 elements: a kernel launch is pure overhead.
        return (-x_flat).reshape(orig_shape)
    y_bulk = _neg_flat_aligned(x_flat[:n_bulk])
    y_tail = -x_flat[n_bulk:]
    return jnp.concatenate([y_bulk, y_tail]).reshape(orig_shape)


if __name__ == "__main__":
    key = jax.random.PRNGKey(0)

    # Small example input consistent with a typical NCHW activation tensor.
    x = jax.random.normal(key, (2, 4, 16, 16), dtype=jnp.float32)
    loss = my_loss_neg(x)
    jax.block_until_ready(loss)
    assert loss.shape == x.shape
    assert loss.dtype == x.dtype
    assert bool(jnp.allclose(loss, -x)), "mismatch vs reference -x"

    # A moderately sized tensor that exercises the multi-block (>=2 step)
    # pipelined grid path.
    x_big = jax.random.normal(jax.random.PRNGKey(1), (4, 8, 128, 128),
                              dtype=jnp.float32)
    loss_big = my_loss_neg(x_big)
    jax.block_until_ready(loss_big)
    assert bool(jnp.allclose(loss_big, -x_big)), "mismatch on multi-block path"

    # Exercise the odd-size fallback path (n not a multiple of 128).
    x_odd = jax.random.normal(jax.random.PRNGKey(2), (3, 5, 7), dtype=jnp.float32)
    loss_odd = my_loss_neg(x_odd)
    jax.block_until_ready(loss_odd)
    assert bool(jnp.allclose(loss_odd, -x_odd)), "mismatch on fallback path"

    print("KERNEL_OK")
</pallas_src>

<mosaic_0001>
module attributes {stable_mosaic.version = 11 : i64} {
  func.func @_neg_kernel(%arg0: i32, %arg1: memref<1x2048xf32, #tpu.memory_space<vmem>>, %arg2: memref<1x2048xf32, #tpu.memory_space<vmem>>) attributes {dimension_semantics = [#tpu.dimension_semantics<parallel>], iteration_bounds = array<i64: 1>, scalar_prefetch = 0 : i64, scratch_operands = 0 : i64, tpu.core_type = #tpu.core_type<tc>, window_params = [{transform_indices = @transform_0, window_bounds = array<i64: 1, 2048>}, {transform_indices = @transform_1, window_bounds = array<i64: 1, 2048>}]} {
    %c0 = arith.constant 0 : index
    %c0_0 = arith.constant 0 : index
    %0 = vector.load %arg1[%c0, %c0_0] : memref<1x2048xf32, #tpu.memory_space<vmem>>, vector<1x2048xf32>
    %cst = arith.constant 0.000000e+00 : f32
    %1 = vector.broadcast %cst : f32 to vector<1x2048xf32>
    %2 = arith.subf %1, %0 : vector<1x2048xf32>
    %c0_1 = arith.constant 0 : index
    %c0_2 = arith.constant 0 : index
    %3 = vector.load %arg2[%c0_1, %c0_2] : memref<1x2048xf32, #tpu.memory_space<vmem>>, vector<1x2048xf32>
    tpu.vector_store %arg2[%c0_1, %c0_2], %2 {strides = array<i32>} : memref<1x2048xf32, #tpu.memory_space<vmem>>, vector<1x2048xf32>,
    return
  }
  func.func @transform_0(%arg0: i32) -> (i32, i32) {
    %c0_i32 = arith.constant 0 : i32
    %c0_i32_0 = arith.constant 0 : i32
    return %arg0, %c0_i32 : i32, i32
  }
  func.func @transform_1(%arg0: i32) -> (i32, i32) {
    %c0_i32 = arith.constant 0 : i32
    %c0_i32_0 = arith.constant 0 : i32
    return %arg0, %c0_i32 : i32, i32
  }
}

</mosaic_0001>

<bundles_post_ra>
// kernel: tpu_custom_call.1
= control target key start
LH: loop header
LB: loop body
LE: loop exit
PB: predicated region body
PF: predicated region fallthrough
CT: control target
= control target key end

     0   :  { %6 = vsyncpa [#allocation3], 0  ;;  %s106_s0 = inlined_call_operand.hbm [shape: f32[1,2048], index: 0, kind: input, shape index: {}]   ;;  %s107_s1 = inlined_call_operand.hbm [shape: f32[1,2048], index: 1, kind: output, shape index: {}]  }
   0x1   :  { %7 = vsyncpa [#allocation4], 0  ;;  %s88_s6 = smov [#allocation2]  }
   0x2   :  { %s14_s7 = sshll.u32 %s88_s6, 4  ;;  %s15_s7 = int_to_ptr.vmem [resolvable:$true] %s14_s7 }
   0x3   :  { %s52_s8 = scalar_lea.vmem %s15_s7, 256  ;;  %p57_p1 = scmp.lt.s32.totalorder %s15_s7, %s15_s7 }
   0x4   :  { %p53_p0 = scmp.ne.s32.totalorder %s15_s7, %s52_s8  ;;  %p58_p2 = scmp.lt.s32.totalorder %s52_s8, %s52_s8 }
   0x6   :  { %p59_p3 = por %p58_p2, %p57_p1 }
   0x8   :  { %p60_p4 = pnand %p59_p3, %p53_p0 }
   0xa   :  { %63 = shalt.err (!%p60_p4)
}
   0xb   :  { %17 = dma.hbm_to_vmem [thread:$0]  %s106_s0, 256, %s15_s7, [#allocation3]  }
   0xc   :  { %84 = dma.done.wait [#allocation3], 256  }
   0xd   :  { %85 = vsyncadd [#allocation3], 4294967040  ;;  %s89_s11 = smov [#allocation5]   ;;  %v21_v0 = vld [vmem:[#allocation2] sm:$0xff]  ;;  %v22_v1 = vld [vmem:[#allocation2 + $0x8] sm:$0xff] }
   0xe   :  { %s33_s12 = sshll.u32 %s89_s11, 4  ;;  %v23_v2 = vsub.f32 0.0, %v21_v0  ;;  %v24_v3 = vsub.f32 0.0, %v22_v1  ;;  %s34_s12 = int_to_ptr.vmem [resolvable:$true] %s33_s12 }
   0xf   :  { %s64_s13 = scalar_lea.vmem %s34_s12, 256  ;;  %p69_p6 = scmp.lt.s32.totalorder %s34_s12, %s34_s12 }
  0x10   :  { %25 = vst [vmem:[#allocation5] sm:$0xff] %v23_v2  ;;  %26 = vst [vmem:[#allocation5 + $0x8] sm:$0xff] %v24_v3  ;;  %p65_p5 = scmp.ne.s32.totalorder %s34_s12, %s64_s13  ;;  %p70_p7 = scmp.lt.s32.totalorder %s64_s13, %s64_s13 }
  0x12   :  { %p71_p8 = por %p70_p7, %p69_p6 }
  0x14   :  { %p72_p9 = pnand %p71_p8, %p65_p5 }
  0x16   :  { %75 = shalt.err (!%p72_p9)
}
  0x17   :  { %36 = dma.vmem_to_hbm [thread:$0]  %s34_s12, 256, %s107_s1, [#allocation4]  }
  0x18   :  { %86 = dma.done.wait [#allocation4], 256  }
  0x19   :  { %87 = vsyncadd [#allocation4], 4294967040 }
  0x1a   :  { %40 = vsyncpa [#allocation3], 1 }
  0x1b   :  { %41 = vsyncpa [#allocation4], 1 }

</bundles_post_ra>
